<compile_context>
chip_gen: v5e
topology: v5e:2x2
jax: 0.10.0
libtpu: 0.0.40
codegen_flags: <defaults>
</compile_context>

<pallas_src>
import functools

import jax
import jax.numpy as jnp
from jax.experimental import pallas as pl
from jax.experimental.pallas import tpu as pltpu


def _round_up(x, m):
    return ((x + m - 1) // m) * m


def _vmem_capacity_bytes():
    # Generation-aware VMEM capacity (128 MiB v5e/v6e, 64 MiB per-TC v7x).
    try:
        return int(pltpu.get_tpu_info().vmem_capacity_bytes)
    except Exception:
        return 64 << 20  # conservative (v7x per-TC) fallback


def _vmem_budgets():
    cap = _vmem_capacity_bytes()
    # Leave ~12 MiB headroom for compiler-internal scratch / semaphores, and a
    # further 4 MiB margin for the tile budget:
    #   v7x  (64 MiB): limit ~52 MiB, tile budget ~48 MiB
    #   v5e/v6e (128): limit ~116 MiB, tile budget ~112 MiB
    vmem_limit = max(cap - (12 << 20), cap // 2)
    tile_budget = vmem_limit - (4 << 20)
    return int(vmem_limit), int(tile_budget)


def plan_lm_head(E, V, *, out_bytes=4, tm_max=256):
    """Pick the vocab stripe width tn and padded vocab size (M-independent)."""
    vmem_limit, budget = _vmem_budgets()
    V128 = _round_up(V, 128)

    def tile_bytes(tm, tn):
        # double-buffered activation, weight stripe, bias stripe, output tile
        return 2 * (tm * E * 2) + 2 * (E * tn * 2) + 2 * (tn * 4) \
            + 2 * (tm * tn * out_bytes)

    # Single-stripe case: the whole (lane-padded) vocab fits as one weight tile.
    if tile_bytes(tm_max, V128) <= budget:
        return dict(tn=V128, V_pad=V128, vmem_limit=vmem_limit, budget=budget)

    # Otherwise: power-of-two stripes; pad V to a multiple of 2048 so every
    # candidate tn divides V_pad (<2% padding overhead for LM-sized vocabs).
    V_pad = _round_up(V, 2048)
    tn = 128
    for cand in (2048, 1024, 512, 256, 128):
        if tile_bytes(tm_max, cand) <= budget:
            tn = cand
            break
    return dict(tn=tn, V_pad=V_pad, vmem_limit=vmem_limit, budget=budget)


def prepare_lm_head(w_out, b_out, plan):
    """One-time (hoisted) bf16 cast + vocab padding of the LM-head weights."""
    E, V = w_out.shape
    V_pad = plan["V_pad"]
    w = w_out.astype(jnp.bfloat16)
    b = b_out.reshape(1, V).astype(jnp.float32)
    if V_pad != V:
        w = jnp.pad(w, ((0, 0), (0, V_pad - V)))
        b = jnp.pad(b, ((0, 0), (0, V_pad - V)))
    return w, b


def lm_head_kernel(h_ref, w_ref, b_ref, out_ref):
    # h_ref: (tm, E) bf16   activation tile (tok_emb + pos_emb rows)
    # w_ref: (E, tn) bf16   out_head weight stripe
    # b_ref: (1, tn) f32    out_head bias stripe
    # out_ref: (tm, tn)     logits tile (f32 or bf16)
    acc = jnp.dot(h_ref[...], w_ref[...], preferred_element_type=jnp.float32)
    out_ref[...] = (acc + b_ref[...]).astype(out_ref.dtype)


def gpt_forward(x_ids, tok_emb, pos_emb, w_pad, b_pad, plan, *,
                out_dtype=jnp.float32, tm_max=256):
    """x_ids: int32 [B, S] token ids. Returns logits [B, S, V]."""
    B, S = x_ids.shape
    V, E = tok_emb.shape
    M = B * S
    tn, V_pad = plan["tn"], plan["V_pad"]
    vmem_limit, budget = plan["vmem_limit"], plan["budget"]
    out_bytes = jnp.dtype(out_dtype).itemsize

    # --- embedding gather + positional add (glue; one fused [M,E] slab) ---
    # TODO(synk): with the resident-activation path, fold this gather into a
    #             kernel-prologue DMA to save one [M, E] HBM round trip.
    tok = jnp.take(tok_emb, x_ids.reshape(-1), axis=0).reshape(B, S, E)
    h = (tok + pos_emb[:S][None, :, :]).reshape(M, E)
    # TODO(synk): TransformerBlock is undefined in the reference module; identity.
    # TODO(synk): NormLayer.__init__ is an empty stub (no params, no op); identity.
    h = h.astype(jnp.bfloat16)

    # --- row tiling (bf16 vregs pack 16 sublanes) ---
    M16 = _round_up(M, 16)
    # Resident-activation variant: if the full activation slab + one weight
    # stripe + output tile fits the tile budget, collapse the row grid so the
    # activations are DMA'd exactly once instead of V_pad/tn times.
    resident_need = 2 * (M16 * E * 2) + 2 * (E * tn * 2) + 2 * (tn * 4) \
        + 2 * (M16 * tn * out_bytes)
    tm = M16 if resident_need <= budget else min(tm_max, M16)
    M_pad = _round_up(M, tm)
    if M_pad != M:
        h = jnp.pad(h, ((0, M_pad - M), (0, 0)))

    # Weight (vocab) stripe is the slow-varying grid axis: each (E, tn) weight
    # tile is DMA'd once per stripe; on v7x the megacore split lands on the
    # vocab stripes so the two cores read disjoint halves of the big weight.
    grid = (V_pad // tn, M_pad // tm)

    cost = pl.CostEstimate(
        flops=2 * M_pad * E * V_pad,
        transcendentals=0,
        bytes_accessed=(M_pad * E * 2 + E * V_pad * 2 + V_pad * 4
                        + M_pad * V_pad * out_bytes),
    )

    logits = pl.pallas_call(
        lm_head_kernel,
        out_shape=jax.ShapeDtypeStruct((M_pad, V_pad), out_dtype),
        grid_spec=pltpu.PrefetchScalarGridSpec(
            num_scalar_prefetch=0,
            grid=grid,
            in_specs=[
                pl.BlockSpec((tm, E), lambda j, i: (i, 0)),   # activations
                pl.BlockSpec((E, tn), lambda j, i: (0, j)),   # weight stripe
                pl.BlockSpec((1, tn), lambda j, i: (0, j)),   # bias stripe
            ],
            out_specs=pl.BlockSpec((tm, tn), lambda j, i: (i, j)),
        ),
        compiler_params=pltpu.CompilerParams(
            dimension_semantics=("parallel", "parallel"),
            vmem_limit_bytes=int(vmem_limit),
        ),
        cost_estimate=cost,
    )(h, w_pad, b_pad)

    return logits[:M, :V].reshape(B, S, V)


def make_forward(params, *, out_dtype=jnp.float32):
    """Plans tiles and pre-casts/pads the LM-head weights ONCE (hot-path hoist)."""
    V, E = params["tok_emb"].shape
    plan = plan_lm_head(E, V, out_bytes=jnp.dtype(out_dtype).itemsize)
    w_pad, b_pad = prepare_lm_head(params["w_out"], params["b_out"], plan)
    tok_emb, pos_emb = params["tok_emb"], params["pos_emb"]

    @jax.jit
    def fwd(x_ids):
        return gpt_forward(x_ids, tok_emb, pos_emb, w_pad, b_pad, plan,
                           out_dtype=out_dtype)

    return fwd


def init_params(key, *, vocab_size, embedding_dimension, context_length):
    k1, k2, k3, k4 = jax.random.split(key, 4)
    scale = 0.02
    return {
        "tok_emb": scale * jax.random.normal(
            k1, (vocab_size, embedding_dimension), jnp.float32),
        "pos_emb": scale * jax.random.normal(
            k2, (context_length, embedding_dimension), jnp.float32),
        # nn.Linear(E, V) stores weight [V, E]; pre-transposed to [E, V].
        "w_out": scale * jax.random.normal(
            k3, (embedding_dimension, vocab_size), jnp.float32),
        "b_out": scale * jax.random.normal(
            k4, (vocab_size,), jnp.float32),
    }


if __name__ == "__main__":
    cfg = {
        "vocab_size": 128,
        "embedding_dimension": 32,
        "context_length": 16,
        "n_transformer_blocks": 2,   # TransformerBlock undefined upstream -> not applied
    }

    key = jax.random.PRNGKey(0)
    pkey, xkey = jax.random.split(key)
    params = init_params(
        pkey,
        vocab_size=cfg["vocab_size"],
        embedding_dimension=cfg["embedding_dimension"],
        context_length=cfg["context_length"],
    )

    B, S = 2, 8
    x_ids = jax.random.randint(xkey, (B, S), 0, cfg["vocab_size"], dtype=jnp.int32)

    forward = make_forward(params, out_dtype=jnp.float32)
    logits = forward(x_ids)
    jax.block_until_ready(logits)

    # Pure-JAX reference of the same computation (same bf16 casts, f32 accumulate).
    E = cfg["embedding_dimension"]
    tok = jnp.take(params["tok_emb"], x_ids.reshape(-1), axis=0).reshape(B, S, E)
    h_ref = (tok + params["pos_emb"][:S][None]).reshape(B * S, E).astype(jnp.bfloat16)
    ref = jnp.dot(h_ref, params["w_out"].astype(jnp.bfloat16),
                  preferred_element_type=jnp.float32) + params["b_out"]
    ref = ref.reshape(B, S, cfg["vocab_size"])

    assert logits.shape == (B, S, cfg["vocab_size"])
    assert jnp.allclose(logits, ref, atol=2e-3, rtol=2e-3), \
        float(jnp.max(jnp.abs(logits - ref)))

    print("KERNEL_OK")
</pallas_src>

<mosaic_0001>
module attributes {stable_mosaic.version = 11 : i64} {
  func.func @lm_head_kernel(%arg0: i32, %arg1: i32, %arg2: memref<16x32xbf16, #tpu.memory_space<vmem>>, %arg3: memref<32x128xbf16, #tpu.memory_space<vmem>>, %arg4: memref<1x128xf32, #tpu.memory_space<vmem>>, %arg5: memref<16x128xf32, #tpu.memory_space<vmem>>) attributes {dimension_semantics = [#tpu.dimension_semantics<parallel>, #tpu.dimension_semantics<parallel>], iteration_bounds = array<i64: 1, 1>, scalar_prefetch = 0 : i64, scratch_operands = 0 : i64, tpu.core_type = #tpu.core_type<tc>, window_params = [{transform_indices = @transform_0, window_bounds = array<i64: 16, 32>}, {transform_indices = @transform_1, window_bounds = array<i64: 32, 128>}, {transform_indices = @transform_2, window_bounds = array<i64: 1, 128>}, {transform_indices = @transform_3, window_bounds = array<i64: 16, 128>}]} {
    %c0 = arith.constant 0 : index
    %c0_0 = arith.constant 0 : index
    %0 = vector.load %arg2[%c0, %c0_0] : memref<16x32xbf16, #tpu.memory_space<vmem>>, vector<16x32xbf16>
    %c0_1 = arith.constant 0 : index
    %c0_2 = arith.constant 0 : index
    %1 = vector.load %arg3[%c0_1, %c0_2] : memref<32x128xbf16, #tpu.memory_space<vmem>>, vector<32x128xbf16>
    %cst = arith.constant dense<0.000000e+00> : vector<16x128xf32>
    %2 = tpu.matmul %0, %1, %cst {dimension_numbers = #tpu.dot_dimension_numbers<[1], [0], [0], [1], [0, 0, 1, 1], [], []>} : vector<16x32xbf16>, vector<32x128xbf16>, vector<16x128xf32> -> vector<16x128xf32>
    %c0_3 = arith.constant 0 : index
    %c0_4 = arith.constant 0 : index
    %3 = vector.load %arg4[%c0_3, %c0_4] : memref<1x128xf32, #tpu.memory_space<vmem>>, vector<1x128xf32>
    %4 = vector.broadcast %3 : vector<1x128xf32> to vector<16x128xf32>
    %5 = arith.addf %2, %4 : vector<16x128xf32>
    %c0_5 = arith.constant 0 : index
    %c0_6 = arith.constant 0 : index
    %6 = vector.load %arg5[%c0_5, %c0_6] : memref<16x128xf32, #tpu.memory_space<vmem>>, vector<16x128xf32>
    tpu.vector_store %arg5[%c0_5, %c0_6], %5 {strides = array<i32>} : memref<16x128xf32, #tpu.memory_space<vmem>>, vector<16x128xf32>,
    return
  }
  func.func @transform_0(%arg0: i32, %arg1: i32) -> (i32, i32) {
    %c0_i32 = arith.constant 0 : i32
    %c0_i32_0 = arith.constant 0 : i32
    return %arg1, %c0_i32 : i32, i32
  }
  func.func @transform_1(%arg0: i32, %arg1: i32) -> (i32, i32) {
    %c0_i32 = arith.constant 0 : i32
    %c0_i32_0 = arith.constant 0 : i32
    return %c0_i32, %arg0 : i32, i32
  }
  func.func @transform_2(%arg0: i32, %arg1: i32) -> (i32, i32) {
    %c0_i32 = arith.constant 0 : i32
    %c0_i32_0 = arith.constant 0 : i32
    return %c0_i32, %arg0 : i32, i32
  }
  func.func @transform_3(%arg0: i32, %arg1: i32) -> (i32, i32) {
    %c0_i32 = arith.constant 0 : i32
    return %arg1, %arg0 : i32, i32
  }
}

</mosaic_0001>

<bundles_post_ra>
// kernel: fwd.1
= control target key start
LH: loop header
LB: loop body
LE: loop exit
PB: predicated region body
PF: predicated region fallthrough
CT: control target
= control target key end

     0   :  { %s165_s0 = inlined_call_operand.vmem [shape: bf16[16,32], index: 0, kind: input, shape index: {}]   ;;  %s166_s1 = inlined_call_operand.vmem [shape: bf16[32,128], index: 1, kind: input, shape index: {}]   ;;  %s167_s2 = inlined_call_operand.vmem [shape: f32[1,128], index: 2, kind: input, shape index: {}]   ;;  %s168_s3 = inlined_call_operand.hbm [shape: f32[16,128], index: 3, kind: output, shape index: {}]  }
   0x1   :  { %v96_v0 = vld [vmem:[%s166_s1 + $0x8] sm:$0xff] }
   0x2   :  { %8 = vsyncpa [#allocation3], 0  ;;  %53 = vmatpush.bf16.msra.mxu0 %v96_v0  ;;  %v95_v1 = vld [vmem:[%s166_s1] sm:$0xff]  ;;  %vm43_vm0 = vcmask 261120   ;;  %s127_s20 = smov [#allocation2]   ;;  %s69_s1 = sshll.u32 %s168_s3, 4  ;;  %s70_s1 = int_to_ptr.hbm [resolvable:$true] %s69_s1 }
   0x3   :  { %v94_v2 = vld [vmem:[%s165_s0] sm:$0xff]  ;;  %s67_s21 = sshll.u32 %s127_s20, 4  ;;  %s128_s0 = smov 128   ;;  %s68_s21 = int_to_ptr.vmem [resolvable:$true] %s67_s21 }
   0x4   :  { %v100_v3 = vld [vmem:[%s167_s2] ss:$0 sm:$0xff]  ;;  %s129_s24 = smov 8  }
   0x6   :  { %54 = vmatpush.bf16.msra.mxu0 %v95_v1 }
   0x9   :  { %93 = vmatmul.msk.bf16.vlgmr.msra.gmra.mxu0 %vm43_vm0, %v94_v2 }
  0x86   :  { %v56_v4 = vpop.f32.mrf.mxu0 }
  0x87   :  { %v57_v5 = vadd.f32 %v100_v3, %v56_v4 }
  0x89   :  { %61 = vst [vmem:[#allocation2] sm:$0xff] %v57_v5 }
  0x8e   :  { %v58_v6 = vpop.f32.mrf.mxu0 }
  0x8f   :  { %v59_v7 = vadd.f32 %v100_v3, %v58_v6 }
  0x91   :  { %62 = vst [vmem:[#allocation2 + $0x8] sm:$0xff] %v59_v7 }
  0x92   :  { %75 = dma.vmem_to_hbm [thread:$0]  %s68_s21, 256, %s70_s1, [#allocation3], %s128_s0, %s128_s0, %s129_s24  }
  0x93   :  { %125 = dma.done.wait [#allocation3], 256  }
  0x94   :  { %126 = vsyncadd [#allocation3], 4294967040 }
  0x95   :  { %80 = vsyncpa [#allocation3], 1 }

</bundles_post_ra>
